<compile_context>
chip_gen: v7x
topology: tpu7x:2x2x1
jax: 0.10.0
libtpu: 0.0.40
codegen_flags: <defaults>
</compile_context>

<pallas_src>
import jax
import jax.numpy as jnp
from jax.experimental import pallas as pl
from jax.experimental.pallas import tpu as pltpu

_LANE = 128


def _round_up(x, m):
    return ((x + m - 1) // m) * m


def _mse_loss_kernel(logits_ref, targets_ref, mask_ref, partial_ref):
    # Grid = (num_splits, inner_steps); inner axis is the reduction axis.
    i = pl.program_id(1)

    @pl.when(i == 0)
    def _():
        partial_ref[...] = jnp.zeros_like(partial_ref)

    x = logits_ref[...]
    t = targets_ref[...]
    m = mask_ref[...]

    p = jnp.clip(jax.nn.sigmoid(x), 0.0001, 1.0 - 0.0001)
    is_pos = m == 1.0
    # pos -> weight 5, target t;  neg (mask==0) -> weight 1, target 0;
    # anything else (incl. -1 padding) -> weight 0.
    w = jnp.where(is_pos, 5.0, jnp.where(m == 0.0, 1.0, 0.0))
    d = p - jnp.where(is_pos, t, 0.0)

    # Pure VPU accumulation into the resident output block (no per-step reduce).
    partial_ref[0] += w * d * d


def mse_loss(logits, targets, mask, *, tile_rows=2048, num_splits=2):
    """Pallas implementation of MSELoss(reduction='mean').forward."""
    assert logits.shape == targets.shape == mask.shape
    batch_size = logits.shape[0]

    total = logits.size
    rows = pl.cdiv(total, _LANE)
    rows_per_split = pl.cdiv(rows, num_splits)
    tr = min(tile_rows, _round_up(rows_per_split, 8))      # multiple of 8
    inner = pl.cdiv(rows_per_split, tr)
    padded_rows = num_splits * inner * tr
    padded_total = padded_rows * _LANE

    def flat_pad(x, fill):
        x = x.reshape(-1).astype(jnp.float32)
        x = jnp.pad(x, (0, padded_total - total), constant_values=fill)
        return x.reshape(padded_rows, _LANE)

    lg = flat_pad(logits, 0.0)
    tg = flat_pad(targets, 0.0)
    mk = flat_pad(mask, -1.0)   # padding: neither 0.0 nor 1.0 -> zero loss

    in_spec = pl.BlockSpec((tr, _LANE), lambda c, i: (c * inner + i, 0))

    partials = pl.pallas_call(
        _mse_loss_kernel,
        out_shape=jax.ShapeDtypeStruct((num_splits, tr, _LANE), jnp.float32),
        grid_spec=pltpu.PrefetchScalarGridSpec(
            num_scalar_prefetch=0,
            grid=(num_splits, inner),
            in_specs=[in_spec, in_spec, in_spec],
            # Same output block across the inner (reduction) axis -> resident
            # accumulator; one block per split for the parallel axis.
            out_specs=pl.BlockSpec((1, tr, _LANE), lambda c, i: (c, 0, 0)),
        ),
        compiler_params=pltpu.CompilerParams(
            dimension_semantics=("parallel", "arbitrary"),
        ),
    )(lg, tg, mk)

    # Final tiny reduction + mean over batch in plain XLA.
    return jnp.sum(partials) / jnp.float32(batch_size)


def _mse_loss_ref(logits, targets, mask):
    """Plain-JAX reference mirroring the PyTorch module exactly."""
    inputs = jnp.clip(jax.nn.sigmoid(logits), 0.0001, 1.0 - 0.0001)
    pos_id = (mask == 1.0).astype(jnp.float32)
    neg_id = (mask == 0.0).astype(jnp.float32)
    pos_loss = pos_id * (inputs - targets) ** 2
    neg_loss = neg_id * inputs ** 2
    loss = 5.0 * pos_loss + 1.0 * neg_loss
    return jnp.sum(loss) / logits.shape[0]


if __name__ == "__main__":
    # Small shapes consistent with the YOLO loss usage: pred_conf is (B, H*W).
    B, H, W = 2, 16, 16
    N = H * W  # 256

    key = jax.random.PRNGKey(0)
    k1, k2, k3 = jax.random.split(key, 3)
    logits = jax.random.normal(k1, (B, N), dtype=jnp.float32)
    targets = jax.nn.sigmoid(jax.random.normal(k2, (B, N), dtype=jnp.float32))
    # mask (gt_obj): mostly zeros, a few exact ones (objectness targets)
    mask = (jax.random.uniform(k3, (B, N)) > 0.9).astype(jnp.float32)

    out = mse_loss(logits, targets, mask)
    jax.block_until_ready(out)

    ref = _mse_loss_ref(logits, targets, mask)
    assert jnp.allclose(out, ref, rtol=1e-5, atol=1e-5), (out, ref)

    print("KERNEL_OK")
</pallas_src>

<mosaic_0001>
module attributes {stable_mosaic.version = 11 : i64} {
  func.func @_mse_loss_kernel(%arg0: i32, %arg1: i32, %arg2: memref<8x128xf32, #tpu.memory_space<vmem>>, %arg3: memref<8x128xf32, #tpu.memory_space<vmem>>, %arg4: memref<8x128xf32, #tpu.memory_space<vmem>>, %arg5: memref<1x8x128xf32, #tpu.memory_space<vmem>>) attributes {dimension_semantics = [#tpu.dimension_semantics<parallel>, #tpu.dimension_semantics<arbitrary>], iteration_bounds = array<i64: 2, 1>, scalar_prefetch = 0 : i64, scratch_operands = 0 : i64, tpu.core_type = #tpu.core_type<tc>, window_params = [{transform_indices = @transform_0, window_bounds = array<i64: 8, 128>}, {transform_indices = @transform_1, window_bounds = array<i64: 8, 128>}, {transform_indices = @transform_2, window_bounds = array<i64: 8, 128>}, {transform_indices = @transform_3, window_bounds = array<i64: 1, 8, 128>}]} {
    %c0_i32 = arith.constant 0 : i32
    %0 = arith.cmpi eq, %arg1, %c0_i32 : i32
    %1 = arith.extui %0 : i1 to i32
    %c0_i32_0 = arith.constant 0 : i32
    %2 = arith.cmpi ne, %1, %c0_i32_0 : i32
    scf.if %2 {
      %cst_20 = arith.constant 0.000000e+00 : f32
      %35 = vector.broadcast %cst_20 : f32 to vector<1x8x128xf32>
      %c0_21 = arith.constant 0 : index
      %c0_22 = arith.constant 0 : index
      %c0_23 = arith.constant 0 : index
      %36 = vector.load %arg5[%c0_21, %c0_22, %c0_23] : memref<1x8x128xf32, #tpu.memory_space<vmem>>, vector<1x8x128xf32>
      tpu.vector_store %arg5[%c0_21, %c0_22, %c0_23], %35 {strides = array<i32>} : memref<1x8x128xf32, #tpu.memory_space<vmem>>, vector<1x8x128xf32>,
    } else {
    }
    %c0 = arith.constant 0 : index
    %c0_1 = arith.constant 0 : index
    %3 = vector.load %arg2[%c0, %c0_1] : memref<8x128xf32, #tpu.memory_space<vmem>>, vector<8x128xf32>
    %c0_2 = arith.constant 0 : index
    %c0_3 = arith.constant 0 : index
    %4 = vector.load %arg3[%c0_2, %c0_3] : memref<8x128xf32, #tpu.memory_space<vmem>>, vector<8x128xf32>
    %c0_4 = arith.constant 0 : index
    %c0_5 = arith.constant 0 : index
    %5 = vector.load %arg4[%c0_4, %c0_5] : memref<8x128xf32, #tpu.memory_space<vmem>>, vector<8x128xf32>
    %6 = arith.negf %3 : vector<8x128xf32>
    %7 = math.exp %6 : vector<8x128xf32>
    %cst = arith.constant 1.000000e+00 : f32
    %8 = vector.broadcast %cst : f32 to vector<8x128xf32>
    %9 = arith.addf %8, %7 : vector<8x128xf32>
    %10 = arith.divf %8, %9 : vector<8x128xf32>
    %cst_6 = arith.constant 9.99999974E-5 : f32
    %cst_7 = arith.constant 0.999899983 : f32
    %11 = vector.broadcast %cst_6 : f32 to vector<8x128xf32>
    %12 = arith.maximumf %11, %10 : vector<8x128xf32>
    %13 = vector.broadcast %cst_7 : f32 to vector<8x128xf32>
    %14 = arith.minimumf %13, %12 : vector<8x128xf32>
    %cst_8 = arith.constant 1.000000e+00 : f32
    %15 = vector.broadcast %cst_8 : f32 to vector<8x128xf32>
    %16 = arith.cmpf oeq, %5, %15 : vector<8x128xf32>
    %cst_9 = arith.constant 0.000000e+00 : f32
    %17 = vector.broadcast %cst_9 : f32 to vector<8x128xf32>
    %18 = arith.cmpf oeq, %5, %17 : vector<8x128xf32>
    %cst_10 = arith.constant 1.000000e+00 : f32
    %cst_11 = arith.constant 0.000000e+00 : f32
    %19 = vector.broadcast %cst_10 : f32 to vector<8x128xf32>
    %20 = vector.broadcast %cst_11 : f32 to vector<8x128xf32>
    %21 = arith.select %18, %19, %20 : vector<8x128xi1>, vector<8x128xf32>
    %cst_12 = arith.constant 5.000000e+00 : f32
    %22 = vector.broadcast %cst_12 : f32 to vector<8x128xf32>
    %23 = arith.select %16, %22, %21 : vector<8x128xi1>, vector<8x128xf32>
    %cst_13 = arith.constant 0.000000e+00 : f32
    %24 = vector.broadcast %cst_13 : f32 to vector<8x128xf32>
    %25 = arith.select %16, %4, %24 : vector<8x128xi1>, vector<8x128xf32>
    %26 = arith.subf %14, %25 : vector<8x128xf32>
    %c0_14 = arith.constant 0 : index
    %c0_15 = arith.constant 0 : index
    %c0_16 = arith.constant 0 : index
    %27 = vector.load %arg5[%c0_14, %c0_15, %c0_16] : memref<1x8x128xf32, #tpu.memory_space<vmem>>, vector<1x8x128xf32>
    %28 = vector.shape_cast %27 : vector<1x8x128xf32> to vector<8x128xf32>
    %29 = arith.mulf %23, %26 : vector<8x128xf32>
    %30 = arith.mulf %29, %26 : vector<8x128xf32>
    %31 = arith.addf %28, %30 : vector<8x128xf32>
    %c0_17 = arith.constant 0 : index
    %c0_18 = arith.constant 0 : index
    %c0_19 = arith.constant 0 : index
    %32 = vector.load %arg5[%c0_17, %c0_18, %c0_19] : memref<1x8x128xf32, #tpu.memory_space<vmem>>, vector<1x8x128xf32>
    %33 = vector.shape_cast %32 : vector<1x8x128xf32> to vector<8x128xf32>
    %34 = vector.shape_cast %31 : vector<8x128xf32> to vector<1x8x128xf32>
    tpu.vector_store %arg5[%c0_17, %c0_18, %c0_19], %34 {strides = array<i32>} : memref<1x8x128xf32, #tpu.memory_space<vmem>>, vector<1x8x128xf32>,
    return
  }
  func.func @transform_0(%arg0: i32, %arg1: i32) -> (i32, i32) {
    %c1_i32 = arith.constant 1 : i32
    %0 = arith.muli %arg0, %c1_i32 : i32
    %1 = arith.addi %0, %arg1 : i32
    %c0_i32 = arith.constant 0 : i32
    %c0_i32_0 = arith.constant 0 : i32
    return %1, %c0_i32 : i32, i32
  }
  func.func @transform_1(%arg0: i32, %arg1: i32) -> (i32, i32) {
    %c1_i32 = arith.constant 1 : i32
    %0 = arith.muli %arg0, %c1_i32 : i32
    %1 = arith.addi %0, %arg1 : i32
    %c0_i32 = arith.constant 0 : i32
    %c0_i32_0 = arith.constant 0 : i32
    return %1, %c0_i32 : i32, i32
  }
  func.func @transform_2(%arg0: i32, %arg1: i32) -> (i32, i32) {
    %c1_i32 = arith.constant 1 : i32
    %0 = arith.muli %arg0, %c1_i32 : i32
    %1 = arith.addi %0, %arg1 : i32
    %c0_i32 = arith.constant 0 : i32
    %c0_i32_0 = arith.constant 0 : i32
    return %1, %c0_i32 : i32, i32
  }
  func.func @transform_3(%arg0: i32, %arg1: i32) -> (i32, i32, i32) {
    %c0_i32 = arith.constant 0 : i32
    %c0_i32_0 = arith.constant 0 : i32
    %c0_i32_1 = arith.constant 0 : i32
    return %arg0, %c0_i32, %c0_i32_0 : i32, i32, i32
  }
}

</mosaic_0001>

<bundles_post_ra>
// kernel: tpu_custom_call.1
= control target key start
LH: loop header
LB: loop body
LE: loop exit
PB: predicated region body
PF: predicated region fallthrough
CT: control target
= control target key end

     0   :  { %s1010_s0 = inlined_call_operand.hbm [shape: f32[16,128], index: 0, kind: input, shape index: {}]   ;;  %s1011_s1 = inlined_call_operand.hbm [shape: f32[16,128], index: 1, kind: input, shape index: {}]   ;;  %s1012_s2 = inlined_call_operand.hbm [shape: f32[16,128], index: 2, kind: input, shape index: {}]   ;;  %s1013_s3 = inlined_call_operand.hbm [shape: f32[2,8,128], index: 3, kind: output, shape index: {}]  }
   0x1   :  { %1019 = sst [smem:[#allocation15_spill]] %s1011_s1 }
   0x2   :  { %8 = vsyncpa [#allocation3], 0 }
   0x3   :  { %10 = vsyncpa [#allocation3 + $0x1], 0 }
   0x4   :  { %11 = vsyncpa [#allocation6], 0 }
   0x5   :  { %13 = vsyncpa [#allocation6 + $0x1], 0 }
   0x6   :  { %14 = vsyncpa [#allocation4], 0 }
   0x7   :  { %16 = vsyncpa [#allocation4 + $0x1], 0  ;;  %s746_s12 = smov 0   ;;  %s748_s13 = smov 0  }
   0x8   :  { %s750_s14 = smov 0   ;;  %s752_s15 = smov 0  }
   0x9   :  { %s754_s16 = smov 0   ;;  %s756_s17 = smov 0  }
   0xa LB: > { %1020 = sst [smem:[#allocation12_spill]] %s715_s16  ;;  %s777_s18 = sadd.s32 4294967295, %s719_s17   ;;  %s719_s17 = sphi %s756_s17, %s22_s17   ;;  %s715_s16 = sphi %s754_s16, %s1041_s16   ;;  %s711_s15 = sphi %s752_s15, %s1040_s15   ;;  %s707_s14 = sphi %s750_s14, %s1044_s14   ;;  %s703_s13 = sphi %s748_s13, %s1043_s13   ;;  %s699_s12 = sphi %s746_s12, %s1042_s12  }
   0xb   : > { %s447_s19 = sadd.s32 4294967294, %s719_s17   ;;  %s34_s20 = sadd.s32 1, %s715_s16 }
   0xc   : > { %s43_s21 = sadd.s32 1, %s707_s14  ;;  %p36_p0 = scmp.ge.s32.totalorder %s34_s20, 2 }
   0xd   : > { %p50_p1 = scmp.ne.s32.totalorder %s707_s14, %s703_s13  ;;  %p51_p2 = scmp.eq.s32.totalorder %s719_s17, 0 }
   0xe   : > { %p56_p3 = scmp.ne.s32.totalorder %s703_s13, %s699_s12  ;;  %s1046_s20 = smov (%p36_p0, %s34_s20), 0 }
   0xf   : > { %1021 = sst [smem:[#allocation13_spill]] %s1046_s20  ;;  %p789_p4 = por %p51_p2, %p50_p1 }
  0x10   : > { %p57_p5 = scmp.eq.s32.totalorder %s777_s18, 0  ;;  %s40_s23 = ssub.s32 %s715_s16, %s1046_s20 }
  0x11   : > { %p136_p6 = scmp.eq.s32.totalorder %s777_s18, 1  ;;  %p41_p7 = scmp.eq.s32.totalorder %s40_s23, 0 }
  0x12   : > { %p797_p8 = por %p57_p5, %p56_p3  ;;  %p142_p10 = scmp.eq.s32.totalorder %s447_s19, 1 }
  0x13   : > { %p801_p9 = por %p136_p6, %p50_p1  ;;  %p488_p13 = scmp.lt.s32.totalorder %s719_s17, 2 }
  0x14   : > { %s1023_s24 = scalar_select %p797_p8, 1, 0 }
  0x15   : > { %s1024_s25 = scalar_select %p801_p9, 1, 0 }
  0x16   : > { %s806_s26 = scalar_select %p41_p7, %s707_s14, %s43_s21  }
  0x17   : > { %p808_p11 = por %p142_p10, %p56_p3  ;;  %s162_s28 = sand.u32 1, %s707_s14  }
  0x18   : > { %1025 = sst [smem:[#allocation14_spill]] %s806_s26  ;;  %s817_s29 = sshll.u32 %s162_s28, 3 }
  0x19   : > { %s1026_s27 = scalar_select %p808_p11, 1, 0 }
  0x1a   : > { %s820_s30 = sshll.u32 %s715_s16, 7  ;;  %p824_p0 = pnand %p488_p13, %p789_p4 }
  0x1b   : > { %s181_s5 = sand.u32 1, %s719_s17   ;;  %s1028_s1 = sld [smem:[#allocation15_spill]] }
  0x1c   : > { %s1027_s4 = scalar_select %p824_p0, 1, 0 }
  0x1d   : > { %s185_s9 = scalar_lea.vmem [#allocation5], %s817_s29  ;;  %s840_s11 = scalar_lea.sflag [#allocation6], %s181_s5 }
  0x1e   : > { %s193_s10 = sshll.u32 %s185_s9, 4  ;;  %p846_p4 = pneg %p824_p0  ;;  %s837_s10 = int_to_ptr.vmem [resolvable:$true] %s193_s10 }
  0x21   : > { %s833_s8 = scalar_lea.hbm %s1028_s1, %s820_s30  ;;  %s548_s6 = scalar_lea.hbm %s1028_s1, 256 }
  0x22   : > { %s543_s19 = scalar_lea.hbm %s833_s8, 128  ;;  %p549_p7 = scmp.lt.u32.totalorder %s833_s8, %s1028_s1 }
  0x23   : > { %p544_p3 = scmp.ne.s32.totalorder %s833_s8, %s543_s19  ;;  %p550_p10 = scmp.lt.u32.totalorder %s548_s6, %s543_s19 }
  0x24   : > { %p552_p12 = scmp.lt.u32.totalorder %s543_s19, %s833_s8 }
  0x25   : > { %p546_p5 = pnand %p846_p4, %p544_p3  ;;  %p551_p13 = por %p550_p10, %p549_p7 }
  0x27   : > { %p547_p6 = pneg %p546_p5  ;;  %p553_p1 = por %p552_p12, %p551_p13 }
  0x29   : > { %p554_p2 = pnand %p553_p1, %p547_p6 }
  0x2b   : > { %557 = shalt.err (!%p554_p2)
}
  0x2c   : > { %s558_s5 = scalar_lea.vmem %s837_s10, 128  ;;  %s721_s22 = smov [#allocation5]  }
  0x2d   : > { %p559_p3 = scmp.ne.s32.totalorder %s837_s10, %s558_s5  ;;  %s563_s23 = sshll.u32 %s721_s22, 4  ;;  %s564_s23 = int_to_ptr.vmem [resolvable:$false] %s563_s23 }
  0x2e   : > { %s565_s7 = scalar_lea.vmem %s564_s23, 256  ;;  %p566_p9 = scmp.lt.s32.totalorder %s837_s10, %s564_s23 }
  0x2f   : > { %p561_p5 = pnand %p559_p3, %p846_p4  ;;  %p567_p8 = scmp.lt.s32.totalorder %s565_s7, %s558_s5 }
  0x31   : > { %p562_p11 = pneg %p561_p5  ;;  %p568_p7 = por %p567_p8, %p566_p9 }
  0x33   : > { %p569_p10 = pnand %p568_p7, %p562_p11 }
  0x35   : > { %572 = shalt.err (!%p569_p10)
}
  0x36   : > { %480 = dma.hbm_to_vmem [thread:$0]  (!%p824_p0), %s833_s8, 128, %s837_s10, %s840_s11  }
  0x37   : > { %p1030_p12 = scmp.lt.s32.totalorder %s719_s17, 3  ;;  %p1031_p1 = scmp.ge.s32.totalorder %s719_s17, 1 }
  0x38   : > { %s882_s5 = scalar_lea.hbm %s1010_s0, %s820_s30  ;;  %s166_s22 = scalar_lea.vmem [#allocation2], %s817_s29 }
  0x39   : > { %p874_p2 = pnand %p1031_p1, %p1030_p12  ;;  %s174_s23 = sshll.u32 %s166_s22, 4  ;;  %s885_s23 = int_to_ptr.vmem [resolvable:$true] %s174_s23 }
  0x3a   : > { %s891_s7 = scalar_lea.hbm %s1012_s2, %s820_s30  ;;  %s163_s1 = scalar_lea.sflag [#allocation3], %s162_s28 }
  0x3b   : > { %s1032_s19 = scalar_select %p874_p2, 1, 0 }
  0x3c   : > { %s573_s20 = scalar_lea.hbm %s882_s5, 128  ;;  %s578_s16 = scalar_lea.hbm %s1010_s0, 256 }
  0x3d   : > { %p574_p8 = scmp.ne.s32.totalorder %s882_s5, %s573_s20  ;;  %p579_p6 = scmp.lt.u32.totalorder %s882_s5, %s1010_s0 }
  0x3e   : > { %p580_p13 = scmp.lt.u32.totalorder %s578_s16, %s573_s20  ;;  %p582_p5 = scmp.lt.u32.totalorder %s573_s20, %s882_s5 }
  0x3f   : > { %p576_p9 = pnand %p574_p8, %p846_p4 }
  0x40   : > { %p581_p3 = por %p580_p13, %p579_p6 }
  0x41   : > { %p577_p11 = pneg %p576_p9 }
  0x42   : > { %p583_p7 = por %p582_p5, %p581_p3 }
  0x44   : > { %p584_p10 = pnand %p583_p7, %p577_p11 }
  0x46   : > { %587 = shalt.err (!%p584_p10)
}
  0x47   : > { %s588_s28 = scalar_lea.vmem %s885_s23, 128  ;;  %s722_s30 = smov [#allocation2]  }
  0x48   : > { %p589_p12 = scmp.ne.s32.totalorder %s885_s23, %s588_s28  ;;  %s593_s8 = sshll.u32 %s722_s30, 4  ;;  %s594_s8 = int_to_ptr.vmem [resolvable:$false] %s593_s8 }
  0x49   : > { %s595_s26 = scalar_lea.vmem %s594_s8, 256  ;;  %p596_p9 = scmp.lt.s32.totalorder %s885_s23, %s594_s8 }
  0x4a   : > { %p591_p1 = pnand %p589_p12, %p846_p4  ;;  %p597_p2 = scmp.lt.s32.totalorder %s595_s26, %s588_s28 }
  0x4c   : > { %p592_p8 = pneg %p591_p1  ;;  %p598_p6 = por %p597_p2, %p596_p9 }
  0x4e   : > { %p599_p13 = pnand %p598_p6, %p592_p8 }
  0x50   : > { %602 = shalt.err (!%p599_p13)
}
  0x51   : > { %477 = dma.hbm_to_vmem [thread:$0]  (!%p824_p0), %s882_s5, 128, %s885_s23, %s163_s1  }
  0x52   : > { %s204_s16 = scalar_lea.vmem [#allocation7], %s817_s29  ;;  %s603_s10 = scalar_lea.hbm %s891_s7, 128 }
  0x53   : > { %s212_s20 = sshll.u32 %s204_s16, 4  ;;  %p604_p11 = scmp.ne.s32.totalorder %s891_s7, %s603_s10  ;;  %s213_s20 = int_to_ptr.vmem [resolvable:$true] %s212_s20 }
  0x54   : > { %s608_s22 = scalar_lea.hbm %s1012_s2, 256  ;;  %p609_p5 = scmp.lt.u32.totalorder %s891_s7, %s1012_s2 }
  0x55   : > { %p606_p2 = pnand %p604_p11, %p846_p4  ;;  %p610_p7 = scmp.lt.u32.totalorder %s608_s22, %s603_s10 }
  0x56   : > { %p612_p12 = scmp.lt.u32.totalorder %s603_s10, %s891_s7 }
  0x57   : > { %p607_p3 = pneg %p606_p2  ;;  %p611_p10 = por %p610_p7, %p609_p5 }
  0x59   : > { %p613_p1 = por %p612_p12, %p611_p10 }
  0x5b   : > { %p614_p8 = pnand %p613_p1, %p607_p3 }
  0x5d   : > { %617 = shalt.err (!%p614_p8)
}
  0x5e   : > { %s618_s1 = scalar_lea.vmem %s213_s20, 128  ;;  %s723_s29 = smov [#allocation7]  }
  0x5f   : > { %p619_p9 = scmp.ne.s32.totalorder %s213_s20, %s618_s1  ;;  %s623_s5 = sshll.u32 %s723_s29, 4  ;;  %s624_s5 = int_to_ptr.vmem [resolvable:$false] %s623_s5 }
  0x60   : > { %s625_s23 = scalar_lea.vmem %s624_s5, 256  ;;  %p626_p11 = scmp.lt.s32.totalorder %s213_s20, %s624_s5 }
  0x61   : > { %p621_p6 = pnand %p619_p9, %p846_p4  ;;  %p627_p2 = scmp.lt.s32.totalorder %s625_s23, %s618_s1 }
  0x63   : > { %p622_p13 = pneg %p621_p6  ;;  %p628_p0 = por %p627_p2, %p626_p11 }
  0x65   : > { %p629_p5 = pnand %p628_p0, %p622_p13 }
  0x67   : > { %632 = shalt.err (!%p629_p5)
}
  0x68   : > { %p1033_p7 = scmp.ne.s32.totalorder %s1027_s4, 0  ;;  %p1034_p3 = scmp.ne.s32.totalorder %s1032_s19, 0 }
  0x69   : > { %s938_s21 = sand.u32 (!%p1034_p3), 1, %s703_s13   ;;  %p1035_p0 = scmp.ne.s32.totalorder (!%p1034_p3), %s1023_s24, 0 }
  0x6a   : > { %483 = dma.hbm_to_vmem [thread:$0]  (!%p1033_p7), %s891_s7, 128, %s213_s20, %s840_s11  }
  0x6b   : > { %221 = sbr.rel (%p1034_p3) target bundleno = 169 (0xa9), region = 32  ;;  %s941_s8 = sshll.u32 (!%p1034_p3), %s938_s21, 3 }
  0x6c   : > { %s224_s26 = scalar_lea.sflag (!%p1034_p3), [#allocation3], %s938_s21  ;;  %s227_s16 = scalar_lea.vmem (!%p1034_p3), [#allocation2], %s941_s8 }
  0x72   : > { %686 = dma.done.wait (%p1035_p0), %s224_s26, 128  }
  0x73   : > { %688 = vsyncadd (%p1035_p0), %s224_s26, 4294967168  ;;  %s232_s4 = sand.u32 1, %s777_s18   ;;  %s236_s19 = scalar_lea.vmem [#allocation5], %s941_s8 }
  0x74   : > { %s233_s11 = scalar_lea.sflag [#allocation6], %s232_s4 }
  0x75   : > { %690 = dma.done.wait (%p1035_p0), %s233_s11, 256  }
  0x76   : > { %692 = vsyncadd (%p1035_p0), %s233_s11, 4294967040  ;;  %v286_v0 = vld [vmem:[%s227_s16] sm:$0xff]  ;;  %s245_s7 = scalar_lea.vmem [#allocation7], %s941_s8  ;;  %v287_v5 = vld [vmem:[%s236_s19] sm:$0xff]  ;;  %v724_v8 = vmov 0.0   ;;  %s463_s18 = sshll.u32 %s711_s15, 7 }
  0x77   : > { %v461_v1 = vmul.f32 -1.442695, %v286_v0  ;;  %v288_v4 = vld [vmem:[%s245_s7] sm:$0xff]  ;;  %s277_s24 = scalar_lea.vmem [#allocation8], %s941_s8  ;;  %s961_s9 = scalar_lea.hbm %s1013_s3, %s463_s18 }
  0x78   : > { %vm298_vm0 = vcmp.eq.f32.partialorder %v288_v4, 0.0  ;;  %vm297_vm1 = vcmp.eq.f32.partialorder %v288_v4, 1.0  ;;  %s322_s20 = sshll.u32 %s277_s24, 4  ;;  %s309_s22 = scalar_lea.sflag [#allocation4], %s938_s21  ;;  %s963_s20 = int_to_ptr.vmem [resolvable:$true] %s322_s20 }
  0x79   : > { %539 = vpow2.f32 %v461_v1  ;;  %v299_v9 = vsel %vm298_vm0, 1.0, %v724_v8  ;;  %v301_v10 = vsel %vm297_vm1, %v287_v5, 0.0  ;;  %s633_s28 = scalar_lea.vmem %s963_s20, 128  ;;  %p1036_p10 = scmp.ne.s32.totalorder %s1024_s25, 0 }
  0x7a   : > { %v300_v12 = vsel %vm297_vm1, 5.0, %v299_v9  ;;  %p634_p4 = scmp.ne.s32.totalorder %s963_s20, %s633_s28  ;;  %s725_s15 = smov [#allocation8]  }
  0x7b   : > { %s637_s30 = sshll.u32 %s725_s15, 4  ;;  %s638_s30 = int_to_ptr.vmem [resolvable:$false] %s637_s30 }
  0x7c   : > { %p635_p12 = pnand %p634_p4, %p1036_p10  ;;  %s639_s1 = scalar_lea.vmem %s638_s30, 256 }
  0x7d   : > { %p640_p8 = scmp.lt.s32.totalorder %s963_s20, %s638_s30  ;;  %p641_p9 = scmp.lt.s32.totalorder %s639_s1, %s633_s28 }
  0x7e   : > { %p636_p1 = pneg %p635_p12 }
  0x7f   : > { %p642_p6 = por %p641_p9, %p640_p8 }
  0x81   : > { %p643_p13 = pnand %p642_p6, %p636_p1 }
  0x83   : > { %v540_v2 = vpop.eup %539 }
  0x84   : > { %v292_v3 = vadd.f32 1.0, %v540_v2 }
  0x86   : > { %541 = vrcp.f32 %v292_v3 }
  0x90   : > { %v542_v6 = vpop.eup %541 }
  0x91   : > { %v295_v7 = vmax.f32 %v542_v6, 0.0001 }
  0x93   : > { %v296_v11 = vmin.f32 %v295_v7, 0.9999 }
  0x95   : > { %v302_v13 = vsub.f32 %v296_v11, %v301_v10 }
  0x97   : > { %v304_v14 = vmul.f32 %v302_v13, %v300_v12 }
  0x99   : > { %v305_v15 = vmul.f32 %v304_v14, %v302_v13 }
  0x9b   : > { %307 = vst [vmem:[%s277_s24] sm:$0xff] %v305_v15 }
  0x9c   : > { %646 = shalt.err (!%p643_p13)
}
  0x9d   : > { %s647_s29 = scalar_lea.hbm %s961_s9, 128  ;;  %s651_s21 = scalar_lea.hbm %s1013_s3, 256 }
  0x9e   : > { %p648_p11 = scmp.ne.s32.totalorder %s961_s9, %s647_s29  ;;  %p652_p7 = scmp.lt.u32.totalorder %s961_s9, %s1013_s3 }
  0x9f   : > { %p653_p3 = scmp.lt.u32.totalorder %s651_s21, %s647_s29  ;;  %p655_p4 = scmp.lt.u32.totalorder %s647_s29, %s961_s9 }
  0xa0   : > { %p649_p2 = pnand %p648_p11, %p1036_p10 }
  0xa1   : > { %p654_p0 = por %p653_p3, %p652_p7 }
  0xa2   : > { %p650_p5 = pneg %p649_p2 }
  0xa3   : > { %p656_p12 = por %p655_p4, %p654_p0 }
  0xa5   : > { %p657_p1 = pnand %p656_p12, %p650_p5 }
  0xa7   : > { %660 = shalt.err (!%p657_p1)
}
  0xa8   : > { %472 = dma.vmem_to_hbm [thread:$0]  (%p1036_p10), %s963_s20, 128, %s961_s9, %s309_s22  }
  0xa9 PF: > { %s334_s16 = sand.u32 1, %s699_s12   ;;  %p1037_p8 = scmp.ne.s32.totalorder %s1026_s27, 0 }
  0xaa   : > { %p1038_p9 = scmp.ge.s32.totalorder %s719_s17, 2  ;;  %s335_s4 = scalar_lea.sflag [#allocation4], %s334_s16 }
  0xac   : > { %p485_p6 = pnand %p1038_p9, %p1037_p8 }
  0xae   : > { %694 = dma.done.wait (!%p485_p6), %s335_s4, 128  }
  0xaf   : > { %696 = vsyncadd (!%p485_p6), %s335_s4, 4294967168  ;;  %s22_s17 = sadd.s32 1, %s719_s17   ;;  %s1039_s25 = sld [smem:[#allocation14_spill]] }
  0xb0   : > { %p19_p13 = scmp.ge.s32.totalorder %s22_s17, 4   ;;  %s1040_s15 = sld [smem:[#allocation12_spill]] }
  0xb1   : > { %s1041_s16 = sld [smem:[#allocation13_spill]]  ;;  %s1042_s12 = smov %s703_s13 }
  0xb2   : > { %s1043_s13 = smov %s707_s14  ;;  %21 = sbr.rel (!%p19_p13) target bundleno = 10 (0xa), region = 105 }
  0xb5   : > { %s1044_s14 = smov %s1039_s25 }
  0xb9   :  { %340 = vsyncpa [#allocation3], 1 }
  0xba   :  { %342 = vsyncpa [#allocation3 + $0x1], 1 }
  0xbb   :  { %343 = vsyncpa [#allocation6], 1 }
  0xbc   :  { %345 = vsyncpa [#allocation6 + $0x1], 1 }
  0xbd   :  { %346 = vsyncpa [#allocation4], 1 }
  0xbe   :  { %348 = vsyncpa [#allocation4 + $0x1], 1 }

</bundles_post_ra>
